<compile_context>
chip_gen: v7x
topology: tpu7x:2x2x1
jax: 0.10.0
libtpu: 0.0.40
codegen_flags: <defaults>
</compile_context>

<pallas_src>
import jax
import jax.numpy as jnp
from jax.experimental import pallas as pl
from jax.experimental.pallas import tpu as pltpu


def _softplus(z):
    # numerically stable softplus; -logsigmoid(x) == softplus(-x)
    return jnp.maximum(z, 0.0) + jnp.log1p(jnp.exp(-jnp.abs(z)))


def _loss_kernel(q_ref, a_ref, qn_ref, an_ref, ind_ref, out_ref):
    # q_ref, a_ref   : (tb, D)       positive query / answer tiles (f32)
    # qn_ref, an_ref : (tb, N*D)     lane-dense negative tiles (f32)
    # ind_ref        : (N*D, N)      static block-indicator for grouped reduce
    # out_ref        : (1, 8, 128)   per-tile partial-sum slab (lane-dense store)
    q = q_ref[...]
    a = a_ref[...]
    qn = qn_ref[...]
    an = an_ref[...]

    # Positive score over the full embedding dim (== the half-split form).
    score_pos = jnp.sum(q * a, axis=-1, keepdims=True)            # (tb, 1)
    loss_pos = _softplus(-score_pos)                               # -logsigmoid(s)

    # Negative scores: lane-dense elementwise product on the VPU, then the
    # grouped per-sample reduction on the MXU: (tb, N*D) @ (N*D, N) -> (tb, N).
    prod = qn * an
    score_neg = jnp.dot(prod, ind_ref[...],
                        preferred_element_type=jnp.float32)       # (tb, N)
    loss_neg = jnp.mean(_softplus(score_neg), axis=-1, keepdims=True)  # (tb, 1)

    # Per-tile partial sum; batch normalization happens in the wrapper so the
    # grid axis stays fully parallel (both TensorCores on v7x).
    tile_sum = jnp.sum(0.5 * (loss_pos + loss_neg))
    out_ref[...] = jnp.broadcast_to(tile_sum, out_ref.shape)


def _choose_tb(batch, n_neg, dim, target_tile_bytes):
    """Largest batch tile that divides B, is sublane-friendly (multiple of 8 or
    the full batch), and keeps the negative tile near target_tile_bytes."""
    bytes_per_row = 4 * n_neg * dim
    ideal = max(1, target_tile_bytes // bytes_per_row)
    valid = [d for d in range(1, batch + 1)
             if batch % d == 0 and (d % 8 == 0 or d == batch)]
    fitting = [d for d in valid if d <= ideal]
    return max(fitting) if fitting else min(valid)


def embedding_loss_kbgat(query_emb, query_emb_neg, answer_emb, answer_emb_neg,
                         *, tb=None, target_tile_bytes=1 << 20):
    B, D = query_emb.shape
    _, N, _ = query_emb_neg.shape
    assert answer_emb.shape == (B, D)
    assert answer_emb_neg.shape == (B, N, D)

    if tb is None:
        tb = _choose_tb(B, N, D, target_tile_bytes)
    assert B % tb == 0
    num_tiles = B // tb

    # Lane-dense layout for the dominant negative tensors: (B, N, D) -> (B, N*D).
    # Row-major contiguous reshape => no data movement in HBM.
    qn_flat = query_emb_neg.reshape(B, N * D)
    an_flat = answer_emb_neg.reshape(B, N * D)

    # Static 0/1 block indicator: ind[k, n] = 1 iff k belongs to sample n.
    ind = (jnp.arange(N * D, dtype=jnp.int32)[:, None] // D
           == jnp.arange(N, dtype=jnp.int32)[None, :]).astype(jnp.float32)

    # Explicit VMEM budget: double-buffered input tiles + resident indicator +
    # output slab, with headroom.  Kept well under the v7x 64 MiB physical VMEM.
    neg_tile = 4 * tb * N * D
    pos_tile = 4 * tb * D
    out_tile = 4 * 8 * 128
    footprint = 2 * (2 * neg_tile + 2 * pos_tile + 2 * out_tile) + 2 * 4 * N * D * N
    vmem_limit = int(min(max(2 * footprint + (4 << 20), 16 << 20), 48 << 20))

    cost = pl.CostEstimate(
        flops=4 * B * N * D + 4 * B * D,
        transcendentals=2 * B * (N + 1),
        bytes_accessed=8 * B * N * D + 8 * B * D + 4 * N * D * N
                       + 4 * num_tiles * 8 * 128,
    )

    out = pl.pallas_call(
        _loss_kernel,
        out_shape=jax.ShapeDtypeStruct((num_tiles, 8, 128), jnp.float32),
        grid=(num_tiles,),
        in_specs=[
            pl.BlockSpec((tb, D), lambda i: (i, 0)),          # query (pos)
            pl.BlockSpec((tb, D), lambda i: (i, 0)),          # answer (pos)
            # NOTE: pipeline_mode=pl.Buffered(3) on these two is the next lever
            # if profiling shows exposed DMA after tb tuning.
            pl.BlockSpec((tb, N * D), lambda i: (i, 0)),      # query neg (lane-dense)
            pl.BlockSpec((tb, N * D), lambda i: (i, 0)),      # answer neg (lane-dense)
            pl.BlockSpec((N * D, N), lambda i: (0, 0)),       # indicator (resident)
        ],
        out_specs=pl.BlockSpec((1, 8, 128), lambda i: (i, 0, 0)),
        compiler_params=pltpu.CompilerParams(
            dimension_semantics=("parallel",),
            vmem_limit_bytes=vmem_limit,
        ),
        cost_estimate=cost,
    )(query_emb, answer_emb, qn_flat, an_flat, ind)

    partials = out[:, 0, 0]                      # exact per-tile partial sums
    return jnp.sum(partials) / B


def _reference_loss(q, qn, a, an):
    # Reference kept in the original half-split form to validate that dropping
    # the split in the kernel is a pure layout optimization.
    half = q.shape[-1] // 2

    def score(x, y):
        return jnp.sum(x[..., :half] * y[..., :half]
                       + x[..., half:] * y[..., half:], axis=-1)

    loss_pos = _softplus(-score(q, a))                     # (B,)
    loss_neg = jnp.mean(_softplus(score(qn, an)), axis=1)  # (B,)
    return jnp.mean(0.5 * (loss_pos + loss_neg))


if __name__ == "__main__":
    key = jax.random.PRNGKey(0)
    ks = jax.random.split(key, 8)

    # Small shapes consistent with the module (D even: [real | imag] halves).
    B, N, D = 8, 8, 32
    q = jax.random.normal(ks[0], (B, D), dtype=jnp.float32)
    qn = jax.random.normal(ks[1], (B, N, D), dtype=jnp.float32)
    a = jax.random.normal(ks[2], (B, D), dtype=jnp.float32)
    an = jax.random.normal(ks[3], (B, N, D), dtype=jnp.float32)

    loss = jax.block_until_ready(embedding_loss_kbgat(q, qn, a, an))
    ref = _reference_loss(q, qn, a, an)
    assert jnp.allclose(loss, ref, rtol=2e-3, atol=2e-3), (loss, ref)

    # Multi-tile path: force a small tile target so grid > 1 and the parallel
    # per-tile partial outputs are exercised.
    B2 = 32
    q2 = jax.random.normal(ks[4], (B2, D), dtype=jnp.float32)
    qn2 = jax.random.normal(ks[5], (B2, N, D), dtype=jnp.float32)
    a2 = jax.random.normal(ks[6], (B2, D), dtype=jnp.float32)
    an2 = jax.random.normal(ks[7], (B2, N, D), dtype=jnp.float32)
    loss2 = jax.block_until_ready(
        embedding_loss_kbgat(q2, qn2, a2, an2, target_tile_bytes=1024))
    ref2 = _reference_loss(q2, qn2, a2, an2)
    assert jnp.allclose(loss2, ref2, rtol=2e-3, atol=2e-3), (loss2, ref2)

    print("KERNEL_OK")
</pallas_src>

<mosaic_0001>
module attributes {stable_mosaic.version = 11 : i64} {
  func.func @_loss_kernel(%arg0: i32, %arg1: memref<8x32xf32, #tpu.memory_space<vmem>>, %arg2: memref<8x32xf32, #tpu.memory_space<vmem>>, %arg3: memref<8x256xf32, #tpu.memory_space<vmem>>, %arg4: memref<8x256xf32, #tpu.memory_space<vmem>>, %arg5: memref<256x8xf32, #tpu.memory_space<vmem>>, %arg6: memref<1x8x128xf32, #tpu.memory_space<vmem>>) attributes {dimension_semantics = [#tpu.dimension_semantics<parallel>], iteration_bounds = array<i64: 1>, scalar_prefetch = 0 : i64, scratch_operands = 0 : i64, tpu.core_type = #tpu.core_type<tc>, window_params = [{transform_indices = @transform_0, window_bounds = array<i64: 8, 32>}, {transform_indices = @transform_1, window_bounds = array<i64: 8, 32>}, {transform_indices = @transform_2, window_bounds = array<i64: 8, 256>}, {transform_indices = @transform_3, window_bounds = array<i64: 8, 256>}, {pipeline_mode = #tpu.pipeline_mode<synchronous>, transform_indices = @transform_4, window_bounds = array<i64: 256, 8>}, {transform_indices = @transform_5, window_bounds = array<i64: 1, 8, 128>}]} {
    %c0 = arith.constant 0 : index
    %c0_0 = arith.constant 0 : index
    %0 = vector.load %arg1[%c0, %c0_0] : memref<8x32xf32, #tpu.memory_space<vmem>>, vector<8x32xf32>
    %c0_1 = arith.constant 0 : index
    %c0_2 = arith.constant 0 : index
    %1 = vector.load %arg2[%c0_1, %c0_2] : memref<8x32xf32, #tpu.memory_space<vmem>>, vector<8x32xf32>
    %c0_3 = arith.constant 0 : index
    %c0_4 = arith.constant 0 : index
    %2 = vector.load %arg3[%c0_3, %c0_4] : memref<8x256xf32, #tpu.memory_space<vmem>>, vector<8x256xf32>
    %c0_5 = arith.constant 0 : index
    %c0_6 = arith.constant 0 : index
    %3 = vector.load %arg4[%c0_5, %c0_6] : memref<8x256xf32, #tpu.memory_space<vmem>>, vector<8x256xf32>
    %4 = arith.mulf %0, %1 : vector<8x32xf32>
    %cst = arith.constant dense<0.000000e+00> : vector<8xf32>
    %5 = vector.multi_reduction <add>, %4, %cst [1] : vector<8x32xf32> to vector<8xf32>
    %6 = vector.shape_cast %5 : vector<8xf32> to vector<8x1xf32>
    %cst_7 = arith.constant 0.000000e+00 : f32
    %7 = vector.broadcast %cst_7 : f32 to vector<8x1xf32>
    %8 = arith.subf %7, %6 : vector<8x1xf32>
    %cst_8 = arith.constant 0.000000e+00 : f32
    %9 = vector.broadcast %cst_8 : f32 to vector<8x1xf32>
    %10 = arith.maximumf %8, %9 : vector<8x1xf32>
    %11 = math.absf %8 : vector<8x1xf32>
    %cst_9 = arith.constant 0.000000e+00 : f32
    %12 = vector.broadcast %cst_9 : f32 to vector<8x1xf32>
    %13 = arith.subf %12, %11 : vector<8x1xf32>
    %14 = math.exp %13 : vector<8x1xf32>
    %15 = math.log1p %14 : vector<8x1xf32>
    %16 = arith.addf %10, %15 : vector<8x1xf32>
    %17 = arith.mulf %2, %3 : vector<8x256xf32>
    %c0_10 = arith.constant 0 : index
    %c0_11 = arith.constant 0 : index
    %18 = vector.load %arg5[%c0_10, %c0_11] : memref<256x8xf32, #tpu.memory_space<vmem>>, vector<256x8xf32>
    %cst_12 = arith.constant dense<0.000000e+00> : vector<8x8xf32>
    %19 = tpu.matmul %17, %18, %cst_12 {dimension_numbers = #tpu.dot_dimension_numbers<[1], [0], [0], [1], [0, 0, 1, 1], [], []>} : vector<8x256xf32>, vector<256x8xf32>, vector<8x8xf32> -> vector<8x8xf32>
    %cst_13 = arith.constant 0.000000e+00 : f32
    %20 = vector.broadcast %cst_13 : f32 to vector<8x8xf32>
    %21 = arith.maximumf %19, %20 : vector<8x8xf32>
    %22 = math.absf %19 : vector<8x8xf32>
    %cst_14 = arith.constant 0.000000e+00 : f32
    %23 = vector.broadcast %cst_14 : f32 to vector<8x8xf32>
    %24 = arith.subf %23, %22 : vector<8x8xf32>
    %25 = math.exp %24 : vector<8x8xf32>
    %26 = math.log1p %25 : vector<8x8xf32>
    %27 = arith.addf %21, %26 : vector<8x8xf32>
    %cst_15 = arith.constant dense<0.000000e+00> : vector<8xf32>
    %28 = vector.multi_reduction <add>, %27, %cst_15 [1] : vector<8x8xf32> to vector<8xf32>
    %29 = vector.shape_cast %28 : vector<8xf32> to vector<8x1xf32>
    %cst_16 = arith.constant 8.000000e+00 : f32
    %30 = vector.broadcast %cst_16 : f32 to vector<8x1xf32>
    %31 = arith.divf %29, %30 : vector<8x1xf32>
    %32 = arith.addf %16, %31 : vector<8x1xf32>
    %cst_17 = arith.constant 5.000000e-01 : f32
    %33 = vector.broadcast %cst_17 : f32 to vector<8x1xf32>
    %34 = arith.mulf %33, %32 : vector<8x1xf32>
    %35 = vector.shape_cast %34 : vector<8x1xf32> to vector<1x8x1xf32>
    %cst_18 = arith.constant dense<0.000000e+00> : vector<1xf32>
    %36 = vector.multi_reduction <add>, %35, %cst_18 [1, 2] : vector<1x8x1xf32> to vector<1xf32>
    %37 = vector.shape_cast %36 : vector<1xf32> to vector<1x1x1xf32>
    %38 = vector.extract %37[0, 0, 0] : f32 from vector<1x1x1xf32>
    %39 = vector.broadcast %38 : f32 to vector<1x8x128xf32>
    %c0_19 = arith.constant 0 : index
    %c0_20 = arith.constant 0 : index
    %c0_21 = arith.constant 0 : index
    %40 = vector.load %arg6[%c0_19, %c0_20, %c0_21] : memref<1x8x128xf32, #tpu.memory_space<vmem>>, vector<1x8x128xf32>
    tpu.vector_store %arg6[%c0_19, %c0_20, %c0_21], %39 {strides = array<i32>} : memref<1x8x128xf32, #tpu.memory_space<vmem>>, vector<1x8x128xf32>,
    return
  }
  func.func @transform_0(%arg0: i32) -> (i32, i32) {
    %c0_i32 = arith.constant 0 : i32
    %c0_i32_0 = arith.constant 0 : i32
    return %arg0, %c0_i32 : i32, i32
  }
  func.func @transform_1(%arg0: i32) -> (i32, i32) {
    %c0_i32 = arith.constant 0 : i32
    %c0_i32_0 = arith.constant 0 : i32
    return %arg0, %c0_i32 : i32, i32
  }
  func.func @transform_2(%arg0: i32) -> (i32, i32) {
    %c0_i32 = arith.constant 0 : i32
    %c0_i32_0 = arith.constant 0 : i32
    return %arg0, %c0_i32 : i32, i32
  }
  func.func @transform_3(%arg0: i32) -> (i32, i32) {
    %c0_i32 = arith.constant 0 : i32
    %c0_i32_0 = arith.constant 0 : i32
    return %arg0, %c0_i32 : i32, i32
  }
  func.func @transform_4(%arg0: i32) -> (i32, i32) {
    %c0_i32 = arith.constant 0 : i32
    %c0_i32_0 = arith.constant 0 : i32
    %c0_i32_1 = arith.constant 0 : i32
    return %c0_i32, %c0_i32_0 : i32, i32
  }
  func.func @transform_5(%arg0: i32) -> (i32, i32, i32) {
    %c0_i32 = arith.constant 0 : i32
    %c0_i32_0 = arith.constant 0 : i32
    %c0_i32_1 = arith.constant 0 : i32
    return %arg0, %c0_i32, %c0_i32_0 : i32, i32, i32
  }
}

</mosaic_0001>

<bundles_post_ra>
// kernel: tpu_custom_call.1
= control target key start
LH: loop header
LB: loop body
LE: loop exit
PB: predicated region body
PF: predicated region fallthrough
CT: control target
= control target key end

     0   :  { %vm28_vm0 = vcmask 261120   ;;  %s461_s0 = inlined_call_operand.vmem [shape: f32[8,32], index: 0, kind: input, shape index: {}]   ;;  %s462_s1 = inlined_call_operand.vmem [shape: f32[8,32], index: 1, kind: input, shape index: {}]   ;;  %s463_s2 = inlined_call_operand.vmem [shape: f32[8,256], index: 2, kind: input, shape index: {}]   ;;  %s464_s3 = inlined_call_operand.vmem [shape: f32[8,256], index: 3, kind: input, shape index: {}]   ;;  %s465_s4 = inlined_call_operand.vmem [shape: f32[256,8], index: 4, kind: input, shape index: {}]   ;;  %s466_s5 = inlined_call_operand.hbm [shape: f32[1,8,128], index: 5, kind: output, shape index: {}]  }
   0x1   :  { %v66_v0 = vld [vmem:[%s465_s4 + $0x80] sm:$0xff]  ;;  %v67_v1 = vld [vmem:[%s465_s4 + $0x88] sm:$0xff]  ;;  %v68_v5 = vld [vmem:[%s465_s4 + $0x90] sm:$0xff] }
   0x2   :  { %v50_v2 = vld [vmem:[%s465_s4] sm:$0xff]  ;;  %v237_v3 = vpack.c.bf16 %v67_v1, %v66_v0  ;;  %v51_v4 = vld [vmem:[%s465_s4 + $0x8] sm:$0xff]  ;;  %v69_v6 = vld [vmem:[%s465_s4 + $0x98] sm:$0xff] }
   0x3   :  { %v239_v7 = vpack.c.bf16 %v51_v4, %v50_v2  ;;  %v241_v8 = vpack.c.bf16 %v69_v6, %v68_v5  ;;  %v52_v9 = vld [vmem:[%s465_s4 + $0x10] sm:$0xff]  ;;  %v53_v10 = vld [vmem:[%s465_s4 + $0x18] sm:$0xff]  ;;  %v70_v11 = vld [vmem:[%s465_s4 + $0xa0] sm:$0xff] }
   0x4   :  { %238 = vmatprep.subr.bf16.mxu0 %v237_v3  ;;  %v71_v12 = vld [vmem:[%s465_s4 + $0xa8] sm:$0xff]  ;;  %v243_v13 = vpack.c.bf16 %v53_v10, %v52_v9  ;;  %v54_v15 = vld [vmem:[%s465_s4 + $0x20] sm:$0xff]  ;;  %v72_v17 = vld [vmem:[%s465_s4 + $0xb0] sm:$0xff] }
   0x5   :  { %240 = vmatpush3.bf16.msra.mxu0 %v239_v7  ;;  %v245_v14 = vpack.c.bf16 %v71_v12, %v70_v11  ;;  %v55_v16 = vld [vmem:[%s465_s4 + $0x28] sm:$0xff]  ;;  %v73_v18 = vld [vmem:[%s465_s4 + $0xb8] sm:$0xff]  ;;  %v56_v21 = vld [vmem:[%s465_s4 + $0x30] sm:$0xff] }
   0x6   :  { %242 = vmatprep.subr.bf16.mxu0 %v241_v8  ;;  %v247_v19 = vpack.c.bf16 %v55_v16, %v54_v15  ;;  %v249_v20 = vpack.c.bf16 %v73_v18, %v72_v17  ;;  %v57_v22 = vld [vmem:[%s465_s4 + $0x38] sm:$0xff]  ;;  %v74_v23 = vld [vmem:[%s465_s4 + $0xc0] sm:$0xff]  ;;  %v75_v24 = vld [vmem:[%s465_s4 + $0xc8] sm:$0xff] }
   0x7   :  { %v24_v25 = vld [vmem:[%s463_s2 + $0x8] sm:$0xff]  ;;  %v251_v27 = vpack.c.bf16 %v57_v22, %v56_v21  ;;  %v21_v29 = vld [vmem:[%s461_s0] sm:$0xff] }
   0x8   :  { %v26_v26 = vld [vmem:[%s464_s3 + $0x8] sm:$0xff]  ;;  %v22_v30 = vld [vmem:[%s462_s1] sm:$0xff] }
   0x9   :  { %244 = vmatpush3.bf16.msra.mxu0 %v243_v13  ;;  %v49_v28 = vmul.f32 %v26_v26, %v24_v25 }
   0xa   :  { %246 = vmatprep.subr.bf16.mxu0 %v245_v14 }
   0xd   :  { %248 = vmatpush3.bf16.msra.mxu0 %v247_v19 }
   0xe   :  { %10 = vsyncpa [#allocation3], 0  ;;  %250 = vmatprep.subr.bf16.mxu0 %v249_v20  ;;  %v253_v31 = vpack.c.bf16 %v75_v24, %v74_v23  ;;  %v58_v32 = vld [vmem:[%s465_s4 + $0x40] sm:$0xff]  ;;  %v59_v33 = vld [vmem:[%s465_s4 + $0x48] sm:$0xff]  ;;  %v27_v34 = vmul.f32 %v22_v30, %v21_v29  ;;  %146 = vmatprep.mubr.f32.mxu0 %v49_v28  ;;  %vm167_vm2 = vcmask 64512   ;;  %vm175_vm4 = vcmask 7168  }
   0xf   :  { %v76_v35 = vld [vmem:[%s465_s4 + $0xd0] sm:$0xff]  ;;  %v77_v36 = vld [vmem:[%s465_s4 + $0xd8] sm:$0xff]  ;;  %v255_v38 = vpack.c.bf16 %v59_v33, %v58_v32  ;;  %v78_v42 = vld [vmem:[%s465_s4 + $0xe0] sm:$0xff] }
  0x10   :  { %v29_v37 = vsel %vm28_vm0, %v27_v34, 0.0  ;;  %v257_v39 = vpack.c.bf16 %v77_v36, %v76_v35  ;;  %v60_v40 = vld [vmem:[%s465_s4 + $0x50] sm:$0xff]  ;;  %v61_v41 = vld [vmem:[%s465_s4 + $0x58] sm:$0xff]  ;;  %v79_v43 = vld [vmem:[%s465_s4 + $0xe8] sm:$0xff] }
  0x11   :  { %252 = vmatpush3.bf16.msra.mxu0 %v251_v27  ;;  %30 = vadd.xlane.f32.xlu0 %v29_v37  ;;  %v259_v44 = vpack.c.bf16 %v61_v41, %v60_v40  ;;  %v261_v45 = vpack.c.bf16 %v79_v43, %v78_v42  ;;  %v62_v46 = vld [vmem:[%s465_s4 + $0x60] sm:$0xff]  ;;  %v63_v47 = vld [vmem:[%s465_s4 + $0x68] sm:$0xff]  ;;  %v80_v48 = vld [vmem:[%s465_s4 + $0xf0] sm:$0xff] }
  0x12   :  { %254 = vmatprep.subr.bf16.mxu0 %v253_v31  ;;  %v81_v49 = vld [vmem:[%s465_s4 + $0xf8] sm:$0xff]  ;;  %v263_v50 = vpack.c.bf16 %v63_v47, %v62_v46  ;;  %v64_v52 = vld [vmem:[%s465_s4 + $0x70] sm:$0xff]  ;;  %v23_v55 = vld [vmem:[%s463_s2] sm:$0xff]  ;;  %s304_s2 = smov [#allocation2]  }
  0x13   :  { %v265_v51 = vpack.c.bf16 %v81_v49, %v80_v48  ;;  %v65_v53 = vld [vmem:[%s465_s4 + $0x78] sm:$0xff]  ;;  %v25_v56 = vld [vmem:[%s464_s3] sm:$0xff]  ;;  %s194_s3 = sshll.u32 %s304_s2, 4  ;;  %s195_s3 = int_to_ptr.vmem [resolvable:$true] %s194_s3 }
  0x14   :  { %v267_v54 = vpack.c.bf16 %v65_v53, %v64_v52  ;;  %v48_v57 = vmul.f32 %v25_v56, %v23_v55  ;;  %s280_s17 = scalar_lea.vmem %s195_s3, 128  ;;  %p285_p1 = scmp.lt.s32.totalorder %s195_s3, %s195_s3 }
  0x15   :  { %256 = vmatpush3.bf16.msra.mxu0 %v255_v38  ;;  %p281_p0 = scmp.ne.s32.totalorder %s195_s3, %s280_s17  ;;  %p286_p2 = scmp.lt.s32.totalorder %s280_s17, %s280_s17 }
  0x16   :  { %258 = vmatprep.subr.bf16.mxu0 %v257_v39 }
  0x17   :  { %p287_p3 = por %p286_p2, %p285_p1 }
  0x19   :  { %260 = vmatpush3.bf16.msra.mxu0 %v259_v44  ;;  %p288_p4 = pnand %p287_p3, %p281_p0 }
  0x1a   :  { %262 = vmatprep.subr.bf16.mxu0 %v261_v45 }
  0x1d   :  { %264 = vmatpush3.bf16.msra.mxu0 %v263_v50 }
  0x1e   :  { %266 = vmatprep.subr.bf16.mxu0 %v265_v51 }
  0x21   :  { %268 = vmatpush3.bf16.msra.mxu0 %v267_v54 }
  0x24   :  { %147 = vmatmul.mubr.f32.vlgmr.msra.gmra.mrb[0].mxu0 %v48_v57 }
  0x9e   :  { %v31_v12 = vpop.xlane.xlu0 %30 }
  0x9f   :  { %v32_v13 = vsub.f32 0.0, %v31_v12 }
  0xa1   :  { %v34_v14 = vand.u32 2147483647, %v32_v13  ;;  %v33_v25 = vmax.f32 %v32_v13, 0.0 }
  0xa3   :  { %v35_v15 = vsub.f32 0.0, %v34_v14 }
  0xa5   :  { %v36_v16 = vmul.f32 1.442695, %v35_v15 }
  0xf7   :  { %v234_v58 = vpop.f32.mrb[0].mxu0 }
  0xf8   :  { %v235_v59 = vpop.f32.mrb[1].mxu0 }
  0xf9   :  { %v236_v60 = vadd.f32 %v235_v59, %v234_v58 }
  0xfb   :  { %v153_v61 = vand.u32 2147483647, %v236_v60  ;;  %v152_v8 = vmax.f32 %v236_v60, 0.0 }
  0xfd   :  { %v154_v62 = vsub.f32 0.0, %v153_v61 }
  0xff   :  { %v155_v63 = vmul.f32 1.442695, %v154_v62 }
 0x101   :  { %272 = vpow2.f32 %v155_v63 }
 0x10b   :  { %v273_v0 = vpop.eup %272 }
 0x10c   :  { %v157_v1 = vadd.f32 1.0, %v273_v0  ;;  %v160_v2 = vmul.f32 -0.5, %v273_v0  ;;  %v163_v4 = vand.u32 2147483647, %v273_v0 }
 0x10e   :  { %274 = vlog2.f32 %v157_v1  ;;  %v161_v3 = vadd.f32 1.0, %v160_v2  ;;  %vm164_vm1 = vcmp.lt.f32.partialorder %v163_v4, 0.0004427343 }
 0x10f   :  { %276 = vpow2.f32 %v36_v16 }
 0x110   :  { %v162_v7 = vmul.f32 %v273_v0, %v161_v3 }
 0x118   :  { %v275_v5 = vpop.eup %274 }
 0x119   :  { %v159_v6 = vmul.f32 0.6931472, %v275_v5  ;;  %v277_v17 = vpop.eup %276 }
 0x11a   :  { %v38_v18 = vadd.f32 1.0, %v277_v17  ;;  %v41_v19 = vmul.f32 -0.5, %v277_v17  ;;  %v44_v22 = vand.u32 2147483647, %v277_v17 }
 0x11b   :  { %v165_v9 = vsel %vm164_vm1, %v162_v7, %v159_v6 }
 0x11c   :  { %v166_v10 = vadd.f32 %v165_v9, %v152_v8  ;;  %278 = vlog2.f32 %v38_v18  ;;  %v42_v20 = vadd.f32 1.0, %v41_v19  ;;  %vm45_vm3 = vcmp.lt.f32.partialorder %v44_v22, 0.0004427343 }
 0x11e   :  { %v168_v11 = vsel %vm167_vm2, %v166_v10, 0.0  ;;  %v43_v24 = vmul.f32 %v277_v17, %v42_v20 }
 0x11f   :  { %169 = vadd.xlane.f32.xlu0 %v168_v11 }
 0x126   :  { %v279_v21 = vpop.eup %278 }
 0x127   :  { %v40_v23 = vmul.f32 0.6931472, %v279_v21 }
 0x129   :  { %v46_v26 = vsel %vm45_vm3, %v43_v24, %v40_v23 }
 0x12a   :  { %v47_v28 = vadd.f32 %v46_v26, %v33_v25 }
 0x1ac   :  { %v170_v27 = vpop.xlane.xlu0 %169 }
 0x1ad   :  { %v172_v29 = vmul.f32 0.125, %v170_v27 }
 0x1af   :  { %v173_v30 = vadd.f32 %v172_v29, %v47_v28 }
 0x1b1   :  { %v174_v31 = vmul.f32 0.5, %v173_v30 }
 0x1b3   :  { %v176_v32 = vsel %vm175_vm4, %v174_v31, 0.0 }
 0x1b4   :  { %177 = vadd.xlane.f32.xlu1 %v176_v32 }
 0x241   :  { %v178_v33 = vpop.xlane.xlu1 %177 }
 0x242   :  { %v179_v34 = vrot.slane %v178_v33, 4 }
 0x244   :  { %v180_v35 = vadd.f32 %v179_v34, %v178_v33 }
 0x246   :  { %v181_v36 = vrot.slane %v180_v35, 2 }
 0x248   :  { %v182_v37 = vadd.f32 %v181_v36, %v180_v35 }
 0x24a   :  { %v183_v38 = vrot.slane %v182_v37, 1 }
 0x24c   :  { %v184_v39 = vadd.f32 %v183_v38, %v182_v37 }
 0x24e   :  { %269 = vpush %v184_v39 }
 0x27f   :  { %s270_s4 = spop %269 }
 0x280   :  { %v186_v40 = vstv %s270_s4 }
 0x281   :  { %187 = vst [vmem:[#allocation2] sm:$0xff] %v186_v40 }
 0x282   :  { %291 = shalt.err (!%p288_p4)
}
 0x283   :  { %s292_s1 = scalar_lea.hbm %s466_s5, 128 }
 0x284   :  { %p293_p5 = scmp.ne.s32.totalorder %s466_s5, %s292_s1  ;;  %p296_p6 = scmp.lt.u32.totalorder %s292_s1, %s466_s5 }
 0x286   :  { %p298_p7 = pnand %p296_p6, %p293_p5 }
 0x288   :  { %301 = shalt.err (!%p298_p7)
}
 0x289   :  { %197 = dma.vmem_to_hbm [thread:$0]  %s195_s3, 128, %s466_s5, [#allocation3]  }
 0x28a   :  { %302 = dma.done.wait [#allocation3], 128  }
 0x28b   :  { %303 = vsyncadd [#allocation3], 4294967168 }
 0x28c   :  { %201 = vsyncpa [#allocation3], 1 }

</bundles_post_ra>
